<compile_context>
chip_gen: v7x
topology: tpu7x:2x2x1
jax: 0.10.0
libtpu: 0.0.40
codegen_flags: <defaults>
</compile_context>

<pallas_src>
import functools

import jax
import jax.numpy as jnp
from jax.experimental import pallas as pl
from jax.experimental.pallas import tpu as pltpu

# ----------------------------- model config ---------------------------------
NUM_INPUTS   = 16
HIDDEN_SIZES = [32, 32]
NUM_ACTIONS  = 8

# packed layout constants
HALF   = 32            # lane offset of the actor half (max hidden width)
K_PAD  = 128           # contraction width between hidden layers (native MXU feed)
N_PAD  = 128           # output lane width of every packed weight (lane-dense)
A_LANE = 8             # lane where the action logits start in the final layer
TILE_B = 2048          # batch tile for the gridded large-batch path


# ------------------------------- kernel -------------------------------------
def _fused_kernel(x_ref, w0_ref, w_ref, b_ref, out_ref, *, num_rest, num_actions):
    """Fused critic+actor MLP.

    Layer 0 contracts over the natural num_inputs (no padded K); deeper layers
    are block-diagonal 128x128 tiles (critic lanes [0:32), actor [32:64)).
    Output: lane 0 = critic value, lanes [A_LANE:A_LANE+num_actions) = softmax.
    """
    # layer 0: (B, num_inputs) @ (num_inputs, 128)
    h = jnp.maximum(
        jnp.dot(x_ref[...], w0_ref[...], preferred_element_type=jnp.float32)
        + b_ref[0], 0.0)
    # deeper hidden layers: native 128-lane operands, no per-layer lane slicing
    for li in range(num_rest - 1):
        h = jnp.maximum(
            jnp.dot(h, w_ref[li], preferred_element_type=jnp.float32)
            + b_ref[li + 1], 0.0)
    # fused output layer: value at lane 0, action logits at [A_LANE, A_LANE+NA)
    y = (jnp.dot(h, w_ref[num_rest - 1], preferred_element_type=jnp.float32)
         + b_ref[num_rest])

    # row-invariant (1, 128) action-lane mask (single iota + two compares)
    col = jax.lax.broadcasted_iota(jnp.int32, (1, N_PAD), 1)
    is_act = jnp.logical_and(col >= A_LANE, col < A_LANE + num_actions)

    logits = jnp.where(is_act, y, -1e30)
    m = jnp.max(logits, axis=1, keepdims=True)
    e = jnp.exp(logits - m)                    # masked lanes underflow to 0.0
    s = jnp.sum(e, axis=1, keepdims=True)
    soft = e * pl.reciprocal(s, approx=False)

    # merged lane-dense output: softmax on action lanes, raw y elsewhere
    out_ref[...] = jnp.where(is_act, soft, y)


# --------------------------- jitted forward path ----------------------------
@jax.jit
def _forward_impl(x, w0, w, b):
    """x: (batch, num_inputs) f32. Returns (value (batch,1), policy (batch,NA))."""
    batch, nin = x.shape
    L = b.shape[0]
    kernel = functools.partial(_fused_kernel, num_rest=L - 1,
                               num_actions=NUM_ACTIONS)
    vmem = pltpu.MemorySpace.VMEM

    if batch > TILE_B and batch % TILE_B == 0:
        # Large rollout batch: grid over the batch dim; weights/biases use a
        # constant index_map so they stay VMEM-resident across tiles.
        out = pl.pallas_call(
            kernel,
            out_shape=jax.ShapeDtypeStruct((batch, N_PAD), jnp.float32),
            grid=(batch // TILE_B,),
            in_specs=[
                pl.BlockSpec((TILE_B, nin), lambda i: (i, 0)),
                pl.BlockSpec((nin, N_PAD), lambda i: (0, 0)),
                pl.BlockSpec((L - 1, K_PAD, N_PAD), lambda i: (0, 0, 0)),
                pl.BlockSpec((L, 1, N_PAD), lambda i: (0, 0, 0)),
            ],
            out_specs=pl.BlockSpec((TILE_B, N_PAD), lambda i: (i, 0)),
            compiler_params=pltpu.CompilerParams(
                dimension_semantics=("parallel",)),
        )(x, w0, w, b)
    else:
        # Small batch (RL step path): single full-array VMEM block, no grid,
        # no padding of x at all (full-array blocks need no (8,128) alignment).
        out = pl.pallas_call(
            kernel,
            out_shape=jax.ShapeDtypeStruct((batch, N_PAD), jnp.float32),
            in_specs=[pl.BlockSpec(memory_space=vmem)] * 4,
            out_specs=pl.BlockSpec(memory_space=vmem),
        )(x, w0, w, b)

    value  = out[:, 0:1]
    policy = out[:, A_LANE:A_LANE + NUM_ACTIONS]
    return value, policy


def _bucket_batch(batch):
    """Round batch up to a power of two (<= TILE_B) or a multiple of TILE_B,
    so `_forward_impl` only retraces per bucket, not per batch size."""
    if batch <= TILE_B:
        return 1 << (batch - 1).bit_length()
    return -(-batch // TILE_B) * TILE_B


def actor_critic_forward(packed, state):
    """state: 1-D (num_inputs,) like the PyTorch numpy state, or 2-D batch."""
    x = jnp.asarray(state, jnp.float32)
    if x.ndim == 1:
        x = x[None, :]     # torch.from_numpy(state).float().unsqueeze(0)
    batch = x.shape[0]
    bucket = _bucket_batch(batch)
    if bucket != batch:    # only for off-bucket sizes; bucket-sized batches add 0 ops
        x = jnp.concatenate(
            [x, jnp.zeros((bucket - batch, x.shape[1]), jnp.float32)], axis=0)
    value, policy = _forward_impl(x, packed["w0"], packed["w"], packed["b"])
    if bucket != batch:
        value, policy = value[:batch], policy[:batch]
    return value, policy


# --------------------------- parameter handling ------------------------------
def init_params(key, num_inputs, hidden_sizes, num_actions):
    """Deterministic PyTorch-style init: U(-1/sqrt(fan_in), 1/sqrt(fan_in))."""
    def linear(k, out_f, in_f):
        k1, k2 = jax.random.split(k)
        bound = 1.0 / jnp.sqrt(jnp.float32(in_f))
        w = jax.random.uniform(k1, (out_f, in_f), jnp.float32, -bound, bound)
        b = jax.random.uniform(k2, (out_f,), jnp.float32, -bound, bound)
        return w, b

    sizes = [num_inputs] + list(hidden_sizes)
    keys = jax.random.split(key, 2 * len(hidden_sizes) + 2)
    ki = 0
    critic, actor = [], []
    for i in range(len(hidden_sizes)):
        actor.append(linear(keys[ki], sizes[i + 1], sizes[i])); ki += 1
        critic.append(linear(keys[ki], sizes[i + 1], sizes[i])); ki += 1
    actor_out = linear(keys[ki], num_actions, hidden_sizes[-1]); ki += 1
    critic_out = linear(keys[ki], 1, hidden_sizes[-1]); ki += 1
    return {"actor": actor, "actor_out": actor_out,
            "critic": critic, "critic_out": critic_out}


def pack_params(params):
    """One-time packing of PyTorch-layout params into fused, stacked TPU tiles.

    Returns device arrays:
      w0: (num_inputs, N_PAD)       layer-0 fused weights (y = x @ w0 + b[0])
      w : (L-1, K_PAD, N_PAD)       deeper hidden + output layers, 128x128 tiles
      b : (L, 1, N_PAD)             fused biases
    Critic occupies lanes [0:HALF), actor lanes [HALF:2*HALF) in hidden layers;
    the output layer puts the value in lane 0 and the action logits in
    lanes [A_LANE:A_LANE+num_actions).
    """
    critic = list(params["critic"]) + [params["critic_out"]]
    actor  = list(params["actor"])  + [params["actor_out"]]
    num_hidden = len(params["critic"])
    L = num_hidden + 1

    wc0, bc0 = critic[0]
    wa0, ba0 = actor[0]
    nin = wc0.shape[1]
    assert wc0.shape[0] <= HALF and wa0.shape[0] <= HALF

    W0 = jnp.zeros((nin, N_PAD), jnp.float32)
    W0 = W0.at[:, 0:wc0.shape[0]].set(jnp.transpose(wc0))
    W0 = W0.at[:, HALF:HALF + wa0.shape[0]].set(jnp.transpose(wa0))

    B = jnp.zeros((L, 1, N_PAD), jnp.float32)
    B = B.at[0, 0, 0:bc0.shape[0]].set(bc0)
    B = B.at[0, 0, HALF:HALF + ba0.shape[0]].set(ba0)

    WR = jnp.zeros((L - 1, K_PAD, N_PAD), jnp.float32)
    for li in range(1, num_hidden):
        wc, bc = critic[li]
        wa, ba = actor[li]
        assert wc.shape[0] <= HALF and wa.shape[0] <= HALF
        WR = WR.at[li - 1, 0:wc.shape[1], 0:wc.shape[0]].set(jnp.transpose(wc))
        WR = WR.at[li - 1, HALF:HALF + wa.shape[1],
                   HALF:HALF + wa.shape[0]].set(jnp.transpose(wa))
        B = B.at[li, 0, 0:bc.shape[0]].set(bc)
        B = B.at[li, 0, HALF:HALF + ba.shape[0]].set(ba)

    wco, bco = critic[num_hidden]              # (1, h_last), (1,)
    wao, bao = actor[num_hidden]               # (num_actions, h_last), (num_actions,)
    assert A_LANE + wao.shape[0] <= N_PAD
    WR = WR.at[L - 2, 0:wco.shape[1], 0:1].set(jnp.transpose(wco))
    WR = WR.at[L - 2, HALF:HALF + wao.shape[1],
               A_LANE:A_LANE + wao.shape[0]].set(jnp.transpose(wao))
    B = B.at[num_hidden, 0, 0].set(bco[0])
    B = B.at[num_hidden, 0, A_LANE:A_LANE + bao.shape[0]].set(bao)

    # materialize once; these stay resident on device across all forward calls
    return {"w0": jax.device_put(W0), "w": jax.device_put(WR),
            "b": jax.device_put(B)}


# ------------------------------- reference ----------------------------------
def _reference_forward(params, x):
    """Pure-JAX replica of the PyTorch forward. x: (batch, num_inputs)."""
    h = x
    for w, b in params["critic"]:
        h = jax.nn.relu(h @ w.T + b)
    wco, bco = params["critic_out"]
    value = h @ wco.T + bco
    a = x
    for w, b in params["actor"]:
        a = jax.nn.relu(a @ w.T + b)
    wao, bao = params["actor_out"]
    policy = jax.nn.softmax(a @ wao.T + bao, axis=1)
    return value, policy


# --------------------------------- main --------------------------------------
if __name__ == "__main__":
    key = jax.random.PRNGKey(0)
    pkey, skey = jax.random.split(key)
    params = init_params(pkey, NUM_INPUTS, HIDDEN_SIZES, NUM_ACTIONS)
    packed = pack_params(params)   # one-time padding/fusion, kept on device

    # --- single state, exactly like the PyTorch module (unsqueeze(0)) ---
    state = jax.random.normal(skey, (NUM_INPUTS,), jnp.float32)
    value, policy_dist = actor_critic_forward(packed, state)
    jax.block_until_ready((value, policy_dist))

    ref_value, ref_policy = _reference_forward(params, state[None, :])
    assert value.shape == (1, 1) and policy_dist.shape == (1, NUM_ACTIONS)
    assert jnp.allclose(value, ref_value, atol=1e-4, rtol=1e-4)
    assert jnp.allclose(policy_dist, ref_policy, atol=1e-4, rtol=1e-4)
    assert jnp.allclose(jnp.sum(policy_dist), 1.0, atol=1e-5)

    # --- off-bucket small batch (exercises the bucket pad/slice path) ---
    states = jax.random.normal(jax.random.PRNGKey(1), (5, NUM_INPUTS), jnp.float32)
    bvalue, bpolicy = actor_critic_forward(packed, states)
    jax.block_until_ready((bvalue, bpolicy))

    rbv, rbp = _reference_forward(params, states)
    assert bvalue.shape == (5, 1) and bpolicy.shape == (5, NUM_ACTIONS)
    assert jnp.allclose(bvalue, rbv, atol=1e-4, rtol=1e-4)
    assert jnp.allclose(bpolicy, rbp, atol=1e-4, rtol=1e-4)
    assert jnp.allclose(jnp.sum(bpolicy, axis=1), 1.0, atol=1e-5)

    # --- large rollout batch (exercises the gridded, weight-resident path) ---
    big = jax.random.normal(jax.random.PRNGKey(2), (2 * TILE_B, NUM_INPUTS),
                            jnp.float32)
    gvalue, gpolicy = actor_critic_forward(packed, big)
    jax.block_until_ready((gvalue, gpolicy))

    rgv, rgp = _reference_forward(params, big)
    assert gvalue.shape == (2 * TILE_B, 1)
    assert gpolicy.shape == (2 * TILE_B, NUM_ACTIONS)
    assert jnp.allclose(gvalue, rgv, atol=1e-3, rtol=1e-3)
    assert jnp.allclose(gpolicy, rgp, atol=1e-3, rtol=1e-3)

    print("KERNEL_OK")
</pallas_src>

<mosaic_0001>
module attributes {stable_mosaic.version = 11 : i64} {
  func.func @_fused_kernel(%arg0: memref<1x16xf32, #tpu.memory_space<vmem>>, %arg1: memref<16x128xf32, #tpu.memory_space<vmem>>, %arg2: memref<2x128x128xf32, #tpu.memory_space<vmem>>, %arg3: memref<3x1x128xf32, #tpu.memory_space<vmem>>, %arg4: memref<1x128xf32, #tpu.memory_space<vmem>>) attributes {dimension_semantics = [], scalar_prefetch = 0 : i64, scratch_operands = 0 : i64, tpu.core_type = #tpu.core_type<tc>} {
    %c0 = arith.constant 0 : index
    %c0_0 = arith.constant 0 : index
    %0 = vector.load %arg0[%c0, %c0_0] : memref<1x16xf32, #tpu.memory_space<vmem>>, vector<1x16xf32>
    %c0_1 = arith.constant 0 : index
    %c0_2 = arith.constant 0 : index
    %1 = vector.load %arg1[%c0_1, %c0_2] : memref<16x128xf32, #tpu.memory_space<vmem>>, vector<16x128xf32>
    %cst = arith.constant dense<0.000000e+00> : vector<1x128xf32>
    %2 = tpu.matmul %0, %1, %cst {dimension_numbers = #tpu.dot_dimension_numbers<[1], [0], [0], [1], [0, 0, 1, 1], [], []>} : vector<1x16xf32>, vector<16x128xf32>, vector<1x128xf32> -> vector<1x128xf32>
    %c0_3 = arith.constant 0 : index
    %c0_4 = arith.constant 0 : index
    %c0_5 = arith.constant 0 : index
    %3 = vector.load %arg3[%c0_3, %c0_4, %c0_5] : memref<3x1x128xf32, #tpu.memory_space<vmem>>, vector<1x1x128xf32>
    %4 = vector.shape_cast %3 : vector<1x1x128xf32> to vector<1x128xf32>
    %5 = arith.addf %2, %4 : vector<1x128xf32>
    %cst_6 = arith.constant 0.000000e+00 : f32
    %6 = vector.broadcast %cst_6 : f32 to vector<1x128xf32>
    %7 = arith.maximumf %5, %6 : vector<1x128xf32>
    %c0_7 = arith.constant 0 : index
    %c0_8 = arith.constant 0 : index
    %c0_9 = arith.constant 0 : index
    %8 = vector.load %arg2[%c0_7, %c0_8, %c0_9] : memref<2x128x128xf32, #tpu.memory_space<vmem>>, vector<1x128x128xf32>
    %9 = vector.shape_cast %8 : vector<1x128x128xf32> to vector<128x128xf32>
    %cst_10 = arith.constant dense<0.000000e+00> : vector<1x128xf32>
    %10 = tpu.matmul %7, %9, %cst_10 {dimension_numbers = #tpu.dot_dimension_numbers<[1], [0], [0], [1], [0, 0, 1, 1], [], []>} : vector<1x128xf32>, vector<128x128xf32>, vector<1x128xf32> -> vector<1x128xf32>
    %c1 = arith.constant 1 : index
    %c0_11 = arith.constant 0 : index
    %c0_12 = arith.constant 0 : index
    %11 = vector.load %arg3[%c1, %c0_11, %c0_12] : memref<3x1x128xf32, #tpu.memory_space<vmem>>, vector<1x1x128xf32>
    %12 = vector.shape_cast %11 : vector<1x1x128xf32> to vector<1x128xf32>
    %13 = arith.addf %10, %12 : vector<1x128xf32>
    %cst_13 = arith.constant 0.000000e+00 : f32
    %14 = vector.broadcast %cst_13 : f32 to vector<1x128xf32>
    %15 = arith.maximumf %13, %14 : vector<1x128xf32>
    %c1_14 = arith.constant 1 : index
    %c0_15 = arith.constant 0 : index
    %c0_16 = arith.constant 0 : index
    %16 = vector.load %arg2[%c1_14, %c0_15, %c0_16] : memref<2x128x128xf32, #tpu.memory_space<vmem>>, vector<1x128x128xf32>
    %17 = vector.shape_cast %16 : vector<1x128x128xf32> to vector<128x128xf32>
    %cst_17 = arith.constant dense<0.000000e+00> : vector<1x128xf32>
    %18 = tpu.matmul %15, %17, %cst_17 {dimension_numbers = #tpu.dot_dimension_numbers<[1], [0], [0], [1], [0, 0, 1, 1], [], []>} : vector<1x128xf32>, vector<128x128xf32>, vector<1x128xf32> -> vector<1x128xf32>
    %c2 = arith.constant 2 : index
    %c0_18 = arith.constant 0 : index
    %c0_19 = arith.constant 0 : index
    %19 = vector.load %arg3[%c2, %c0_18, %c0_19] : memref<3x1x128xf32, #tpu.memory_space<vmem>>, vector<1x1x128xf32>
    %20 = vector.shape_cast %19 : vector<1x1x128xf32> to vector<1x128xf32>
    %21 = arith.addf %18, %20 : vector<1x128xf32>
    %22 = tpu.iota {dimensions = array<i32: 1>} : vector<1x128xi32>
    %c8_i32 = arith.constant 8 : i32
    %23 = vector.broadcast %c8_i32 : i32 to vector<1x128xi32>
    %24 = arith.cmpi sge, %22, %23 : vector<1x128xi32>
    %c16_i32 = arith.constant 16 : i32
    %25 = vector.broadcast %c16_i32 : i32 to vector<1x128xi32>
    %26 = arith.cmpi slt, %22, %25 : vector<1x128xi32>
    %27 = arith.andi %24, %26 : vector<1x128xi1>
    %cst_20 = arith.constant -1.000000e+30 : f32
    %28 = vector.broadcast %cst_20 : f32 to vector<1x128xf32>
    %29 = arith.select %27, %21, %28 : vector<1x128xi1>, vector<1x128xf32>
    %cst_21 = arith.constant dense<0xFF800000> : vector<1xf32>
    %30 = vector.multi_reduction <maximumf>, %29, %cst_21 [1] : vector<1x128xf32> to vector<1xf32>
    %31 = vector.shape_cast %30 : vector<1xf32> to vector<1x1xf32>
    %32 = vector.broadcast %31 : vector<1x1xf32> to vector<1x128xf32>
    %33 = arith.subf %29, %32 : vector<1x128xf32>
    %34 = math.exp %33 : vector<1x128xf32>
    %cst_22 = arith.constant dense<0.000000e+00> : vector<1xf32>
    %35 = vector.multi_reduction <add>, %34, %cst_22 [1] : vector<1x128xf32> to vector<1xf32>
    %36 = vector.shape_cast %35 : vector<1xf32> to vector<1x1xf32>
    %37 = tpu.reciprocal %36 : vector<1x1xf32> -> vector<1x1xf32>
    %38 = vector.broadcast %37 : vector<1x1xf32> to vector<1x128xf32>
    %39 = arith.mulf %34, %38 : vector<1x128xf32>
    %40 = arith.select %27, %39, %21 : vector<1x128xi1>, vector<1x128xf32>
    %c0_23 = arith.constant 0 : index
    %c0_24 = arith.constant 0 : index
    %41 = vector.load %arg4[%c0_23, %c0_24] : memref<1x128xf32, #tpu.memory_space<vmem>>, vector<1x128xf32>
    tpu.vector_store %arg4[%c0_23, %c0_24], %40 {strides = array<i32>} : memref<1x128xf32, #tpu.memory_space<vmem>>, vector<1x128xf32>,
    return
  }
}

</mosaic_0001>

<bundles_post_ra>
// kernel: _forward_impl.1
= control target key start
LH: loop header
LB: loop body
LE: loop exit
PB: predicated region body
PF: predicated region fallthrough
CT: control target
= control target key end

     0   :  { %9 = vsyncpa [#allocation3], 0  ;;  %s704_s0 = inlined_call_operand.hbm [shape: f32[1,16], index: 0, kind: input, shape index: {}]   ;;  %s705_s1 = inlined_call_operand.hbm [shape: f32[16,128], index: 1, kind: input, shape index: {}]   ;;  %s706_s2 = inlined_call_operand.hbm [shape: f32[2,128,128], index: 2, kind: input, shape index: {}]   ;;  %s707_s3 = inlined_call_operand.vmem [shape: f32[3,1,128], index: 3, kind: input, shape index: {}]   ;;  %s708_s4 = inlined_call_operand.vmem [shape: f32[1,128], index: 4, kind: output, shape index: {}]  }
   0x1   :  { %10 = vsyncpa [#allocation5], 0  ;;  %s589_s15 = smov [#allocation4]   ;;  %s519_s19 = scalar_lea.hbm %s705_s1, 256 }
   0x2   :  { %s26_s16 = sshll.u32 %s589_s15, 4  ;;  %p520_p0 = scmp.ne.s32.totalorder %s705_s1, %s519_s19  ;;  %s27_s16 = int_to_ptr.vmem [resolvable:$true] %s26_s16 }
   0x3   :  { %p523_p1 = scmp.lt.u32.totalorder %s519_s19, %s705_s1 }
   0x5   :  { %p525_p2 = pnand %p523_p1, %p520_p0 }
   0x7   :  { %528 = shalt.err (!%p525_p2)
}
   0x8   :  { %s529_s24 = scalar_lea.vmem %s27_s16, 256  ;;  %p534_p4 = scmp.lt.s32.totalorder %s27_s16, %s27_s16 }
   0x9   :  { %p530_p3 = scmp.ne.s32.totalorder %s27_s16, %s529_s24  ;;  %p535_p5 = scmp.lt.s32.totalorder %s529_s24, %s529_s24 }
   0xb   :  { %p536_p6 = por %p535_p5, %p534_p4 }
   0xd   :  { %p537_p7 = pnand %p536_p6, %p530_p3 }
   0xf   :  { %540 = shalt.err (!%p537_p7)
}
  0x10   :  { %s590_s25 = smov 128   ;;  %s591_s26 = smov 8  }
  0x11   :  { %32 = dma.hbm_to_vmem [thread:$0]  %s705_s1, 256, %s27_s16, [#allocation5], %s590_s25, %s590_s25, %s591_s26  }
  0x12   :  { %s592_s29 = smov [#allocation2]   ;;  %s593_s5 = smov [#allocation6]  }
  0x13   :  { %s17_s30 = sshll.u32 %s592_s29, 4  ;;  %s38_s6 = sshll.u32 %s593_s5, 4  ;;  %s18_s30 = int_to_ptr.vmem [resolvable:$true] %s17_s30  ;;  %s39_s6 = int_to_ptr.vmem [resolvable:$true] %s38_s6 }
  0x14   :  { %s541_s9 = scalar_lea.hbm %s704_s0, 16 }
  0x15   :  { %p542_p8 = scmp.ne.s32.totalorder %s704_s0, %s541_s9  ;;  %p545_p9 = scmp.lt.u32.totalorder %s541_s9, %s704_s0 }
  0x17   :  { %p547_p10 = pnand %p545_p9, %p542_p8 }
  0x19   :  { %550 = shalt.err (!%p547_p10)
}
  0x1a   :  { %s551_s1 = scalar_lea.vmem %s18_s30, 16  ;;  %s555_s14 = scalar_lea.vmem %s18_s30, 32 }
  0x1b   :  { %p552_p11 = scmp.ne.s32.totalorder %s18_s30, %s551_s1  ;;  %p556_p12 = scmp.lt.s32.totalorder %s18_s30, %s18_s30 }
  0x1c   :  { %p557_p13 = scmp.lt.s32.totalorder %s555_s14, %s551_s1 }
  0x1e   :  { %p558_p0 = por %p557_p13, %p556_p12 }
  0x20   :  { %p559_p1 = pnand %p558_p0, %p552_p11 }
  0x22   :  { %562 = shalt.err (!%p559_p1)
}
  0x23   :  { %20 = dma.hbm_to_vmem [thread:$0]  %s704_s0, 16, %s18_s30, [#allocation3]  }
  0x24   :  { %s563_s19 = scalar_lea.hbm %s706_s2, 4096 }
  0x25   :  { %p564_p2 = scmp.ne.s32.totalorder %s706_s2, %s563_s19  ;;  %p567_p3 = scmp.lt.u32.totalorder %s563_s19, %s706_s2 }
  0x27   :  { %p569_p4 = pnand %p567_p3, %p564_p2 }
  0x29   :  { %572 = shalt.err (!%p569_p4)
}
  0x2a   :  { %s573_s24 = scalar_lea.vmem %s39_s6, 4096  ;;  %p578_p6 = scmp.lt.s32.totalorder %s39_s6, %s39_s6 }
  0x2b   :  { %p574_p5 = scmp.ne.s32.totalorder %s39_s6, %s573_s24  ;;  %p579_p7 = scmp.lt.s32.totalorder %s573_s24, %s573_s24 }
  0x2d   :  { %p580_p8 = por %p579_p7, %p578_p6 }
  0x2f   :  { %p581_p9 = pnand %p580_p8, %p574_p5 }
  0x31   :  { %584 = shalt.err (!%p581_p9)
}
  0x32   :  { %44 = dma.hbm_to_vmem [thread:$0]  %s706_s2, 4096, %s39_s6, [#allocation5], %s590_s25, %s590_s25, %s591_s26  }
  0x33   :  { %585 = dma.done.wait [#allocation3], 16  }
  0x34   :  { %586 = vsyncadd [#allocation3], 4294967280 }
  0x35   :  { %587 = dma.done.wait [#allocation5], 4352  }
  0x36   :  { %588 = vsyncadd [#allocation5], 4294962944  ;;  %v594_v0 = vmov 0.0|0.0   ;;  %vm595_vm0 = vmmov 0   ;;  %v596_v1 = vmov 0.0   ;;  %v57_v2 = vld [vmem:[#allocation4] sm:$0xff] }
  0x37   :  { %456 = vmatprep.subr.bf16.mxu0 %v594_v0  ;;  %383 = vmatprep.mubr.msk.f32.mxu0 %vm595_vm0, %v596_v1  ;;  %v58_v3 = vld [vmem:[#allocation4 + $0x8] sm:$0xff]  ;;  %v135_v5 = vld [vmem:[#allocation6] sm:$0xff]  ;;  %v136_v6 = vld [vmem:[#allocation6 + $0x8] sm:$0xff]  ;;  %vm60_vm1 = vcmask 130048   ;;  %vm319_vm5 = vcmask 1040384  }
  0x38   :  { %459 = vmatprep.subr.bf16.mxu1 %v594_v0  ;;  %418 = vmatprep.mubr.msk.f32.mxu1 %vm595_vm0, %v596_v1  ;;  %v457_v4 = vpack.c.bf16 %v58_v3, %v57_v2  ;;  %v137_v7 = vld [vmem:[#allocation6 + $0x10] sm:$0xff]  ;;  %v460_v8 = vpack.c.bf16 %v136_v6, %v135_v5  ;;  %v138_v9 = vld [vmem:[#allocation6 + $0x18] sm:$0xff]  ;;  %v56_v10 = vld [vmem:[#allocation2] sm:$0x1] }
  0x39   :  { %v463_v11 = vpack.c.bf16 %v138_v9, %v137_v7  ;;  %v139_v12 = vld [vmem:[#allocation6 + $0x20] sm:$0xff]  ;;  %v140_v13 = vld [vmem:[#allocation6 + $0x28] sm:$0xff]  ;;  %v141_v15 = vld [vmem:[#allocation6 + $0x30] sm:$0xff] }
  0x3a   :  { %458 = vmatpush3.bf16.msra.mxu0 %v457_v4  ;;  %461 = vmatpush3.bf16.msra.mxu1 %v460_v8  ;;  %v466_v14 = vpack.c.bf16 %v140_v13, %v139_v12  ;;  %v142_v16 = vld [vmem:[#allocation6 + $0x38] sm:$0xff]  ;;  %v143_v18 = vld [vmem:[#allocation6 + $0x40] sm:$0xff]  ;;  %v144_v19 = vld [vmem:[#allocation6 + $0x48] sm:$0xff] }
  0x3b   :  { %483 = vmatprep.subr.bf16.mxu0 %v594_v0  ;;  %462 = vmatprep.subr.bf16.mxu1 %v594_v0  ;;  %v469_v17 = vpack.c.bf16 %v142_v16, %v141_v15  ;;  %v472_v20 = vpack.c.bf16 %v144_v19, %v143_v18  ;;  %v145_v21 = vld [vmem:[#allocation6 + $0x50] sm:$0xff]  ;;  %v146_v22 = vld [vmem:[#allocation6 + $0x58] sm:$0xff]  ;;  %v147_v24 = vld [vmem:[#allocation6 + $0x60] sm:$0xff] }
  0x3c   :  { %v475_v23 = vpack.c.bf16 %v146_v22, %v145_v21  ;;  %v148_v25 = vld [vmem:[#allocation6 + $0x68] sm:$0xff]  ;;  %v149_v27 = vld [vmem:[#allocation6 + $0x70] sm:$0xff]  ;;  %v150_v28 = vld [vmem:[#allocation6 + $0x78] sm:$0xff] }
  0x3d   :  { %384 = vmatmul.mubr.msk.f32.vlgmr.msra.gmra.mrb[0].mxu0 %vm60_vm1, %v56_v10  ;;  %v478_v26 = vpack.c.bf16 %v148_v25, %v147_v24  ;;  %v481_v29 = vpack.c.bf16 %v150_v28, %v149_v27  ;;  %v225_v30 = vld [vmem:[#allocation6 + $0x80] sm:$0xff]  ;;  %v226_v31 = vld [vmem:[#allocation6 + $0x88] sm:$0xff]  ;;  %v227_v32 = vld [vmem:[#allocation6 + $0x90] sm:$0xff] }
  0x3e   :  { %453 = vmatprep.mubr.msk.f32.mxu0 %vm595_vm0, %v596_v1  ;;  %464 = vmatpush3.bf16.msra.mxu1 %v463_v11  ;;  %v484_v33 = vpack.c.bf16 %v226_v31, %v225_v30  ;;  %v228_v34 = vld [vmem:[#allocation6 + $0x98] sm:$0xff]  ;;  %v229_v36 = vld [vmem:[#allocation6 + $0xa0] sm:$0xff]  ;;  %v230_v37 = vld [vmem:[#allocation6 + $0xa8] sm:$0xff] }
  0x3f   :  { %465 = vmatprep.subr.bf16.mxu1 %v594_v0  ;;  %v487_v35 = vpack.c.bf16 %v228_v34, %v227_v32  ;;  %v490_v38 = vpack.c.bf16 %v230_v37, %v229_v36  ;;  %v231_v39 = vld [vmem:[#allocation6 + $0xb0] sm:$0xff]  ;;  %v232_v40 = vld [vmem:[#allocation6 + $0xb8] sm:$0xff]  ;;  %v233_v42 = vld [vmem:[#allocation6 + $0xc0] sm:$0xff] }
  0x40   :  { %485 = vmatpush3.bf16.msra.mxu0 %v484_v33  ;;  %v493_v41 = vpack.c.bf16 %v232_v40, %v231_v39  ;;  %v234_v43 = vld [vmem:[#allocation6 + $0xc8] sm:$0xff]  ;;  %v235_v45 = vld [vmem:[#allocation6 + $0xd0] sm:$0xff]  ;;  %v236_v46 = vld [vmem:[#allocation6 + $0xd8] sm:$0xff] }
  0x41   :  { %486 = vmatprep.subr.bf16.mxu0 %v594_v0  ;;  %v496_v44 = vpack.c.bf16 %v234_v43, %v233_v42  ;;  %v499_v47 = vpack.c.bf16 %v236_v46, %v235_v45  ;;  %v237_v48 = vld [vmem:[#allocation6 + $0xe0] sm:$0xff]  ;;  %v238_v49 = vld [vmem:[#allocation6 + $0xe8] sm:$0xff]  ;;  %v239_v56 = vld [vmem:[#allocation6 + $0xf0] sm:$0xff] }
  0x42   :  { %467 = vmatpush3.bf16.msra.mxu1 %v466_v14  ;;  %v502_v50 = vpack.c.bf16 %v238_v49, %v237_v48  ;;  %v59_v51 = vld [vmem:[%s707_s3] sm:$0x1]  ;;  %v240_v57 = vld [vmem:[#allocation6 + $0xf8] sm:$0xff]  ;;  %v340_v59 = vld [vmem:[%s707_s3 + $0x1] sm:$0x1] }
  0x43   :  { %468 = vmatprep.subr.bf16.mxu1 %v594_v0  ;;  %v505_v58 = vpack.c.bf16 %v240_v57, %v239_v56  ;;  %v341_v2 = vld [vmem:[%s707_s3 + $0x2] sm:$0x1] }
  0x44   :  { %488 = vmatpush3.bf16.msra.mxu0 %v487_v35 }
  0x45   :  { %489 = vmatprep.subr.bf16.mxu0 %v594_v0 }
  0x46   :  { %470 = vmatpush3.bf16.msra.mxu1 %v469_v17 }
  0x47   :  { %471 = vmatprep.subr.bf16.mxu1 %v594_v0 }
  0x48   :  { %491 = vmatpush3.bf16.msra.mxu0 %v490_v38 }
  0x49   :  { %492 = vmatprep.subr.bf16.mxu0 %v594_v0 }
  0x4a   :  { %473 = vmatpush3.bf16.msra.mxu1 %v472_v20 }
  0x4b   :  { %474 = vmatprep.subr.bf16.mxu1 %v594_v0 }
  0x4c   :  { %494 = vmatpush3.bf16.msra.mxu0 %v493_v41 }
  0x4d   :  { %495 = vmatprep.subr.bf16.mxu0 %v594_v0 }
  0x4e   :  { %476 = vmatpush3.bf16.msra.mxu1 %v475_v23 }
  0x4f   :  { %477 = vmatprep.subr.bf16.mxu1 %v594_v0 }
  0x50   :  { %497 = vmatpush3.bf16.msra.mxu0 %v496_v44 }
  0x51   :  { %498 = vmatprep.subr.bf16.mxu0 %v594_v0 }
  0x52   :  { %479 = vmatpush3.bf16.msra.mxu1 %v478_v26 }
  0x53   :  { %480 = vmatprep.subr.bf16.mxu1 %v594_v0 }
  0x54   :  { %500 = vmatpush3.bf16.msra.mxu0 %v499_v47 }
  0x55   :  { %501 = vmatprep.subr.bf16.mxu0 %v594_v0 }
  0x56   :  { %482 = vmatpush3.bf16.msra.mxu1 %v481_v29 }
  0x58   :  { %503 = vmatpush3.bf16.msra.mxu0 %v502_v50 }
  0x59   :  { %504 = vmatprep.subr.bf16.mxu0 %v594_v0  ;;  %v313_v0 = vlaneseq }
  0x5b   :  { %v314_v1 = vand.u32 127, %v313_v0 }
  0x5c   :  { %506 = vmatpush3.bf16.msra.mxu0 %v505_v58 }
  0x5d   :  { %vm315_vm2 = vcmp.ge.s32.totalorder %v314_v1, 8  ;;  %vm316_vm3 = vcmp.lt.s32.totalorder %v314_v1, 16 }
  0x5e   :  { %vm693_vm4 = vmand %vm315_vm2, %vm316_vm3 }
 0x110   :  { %v130_v52 = vpop.f32.mrb[0].mxu0 }
 0x111   :  { %v131_v53 = vadd.f32 %v130_v52, %v59_v51  ;;  %v385_v54 = vpop.f32.mrb[1].mxu0 }
 0x113   :  { %v134_v55 = vmax.f32 %v131_v53, 0.0 }
 0x115   :  { %419 = vmatmul.mubr.f32.vlgmr.msra.gmra.mrb[0].mxu1 %v134_v55 }
 0x1e8   :  { %v219_v60 = vpop.f32.mrb[0].mxu1 }
 0x1e9   :  { %v220_v61 = vadd.f32 %v340_v59, %v219_v60  ;;  %v420_v62 = vpop.f32.mrb[1].mxu1 }
 0x1eb   :  { %v223_v63 = vmax.f32 %v220_v61, 0.0 }
 0x1ed   :  { %454 = vmatmul.mubr.f32.vlgmr.msra.gmra.mrb[2].mxu0 %v223_v63 }
 0x2c0   :  { %v309_v3 = vpop.f32.mrb[2].mxu0 }
 0x2c1   :  { %v310_v5 = vadd.f32 %v341_v2, %v309_v3  ;;  %v455_v6 = vpop.f32.mrb[3].mxu0 }
 0x2c3   :  { %v318_v7 = vsel %vm693_vm4, %v310_v5, -1e+30 }
 0x2c4   :  { %v320_v8 = vsel %vm319_vm5, %v318_v7, -inf }
 0x2c5   :  { %321 = vmax.xlane.f32.xlu0 %v320_v8 }
 0x352   :  { %v322_v9 = vpop.xlane.xlu0 %321 }
 0x353   :  { %v323_v10 = vsub.f32 %v318_v7, %v322_v9 }
 0x355   :  { %v324_v11 = vmul.f32 1.442695, %v323_v10 }
 0x357   :  { %515 = vpow2.f32 %v324_v11 }
 0x361   :  { %v516_v12 = vpop.eup %515 }
 0x362   :  { %v326_v13 = vsel %vm319_vm5, %v516_v12, 0.0 }
 0x363   :  { %327 = vadd.xlane.f32.xlu0 %v326_v13 }
 0x3f0   :  { %v328_v14 = vpop.xlane.xlu0 %327 }
 0x3f1   :  { %517 = vrcp.f32 %v328_v14 }
 0x3fb   :  { %v518_v15 = vpop.eup %517 }
 0x3fc   :  { %v330_v16 = vmul.f32 %v518_v15, %v516_v12 }
 0x3fe   :  { %v331_v17 = vsel %vm693_vm4, %v330_v16, %v310_v5 }
 0x3ff   :  { %332 = vst [vmem:[%s708_s4] sm:$0x1] %v331_v17 }
 0x400   :  { %337 = vsyncpa [#allocation3], 1 }
 0x401   :  { %338 = vsyncpa [#allocation5], 1 }

</bundles_post_ra>
